<compile_context>
chip_gen: v6e
topology: v6e:2x2x1
jax: 0.10.0
libtpu: 0.0.40
codegen_flags: <defaults>
</compile_context>

<pallas_src>
from functools import partial

import jax
import jax.numpy as jnp
import numpy as np
from jax.experimental import pallas as pl
from jax.experimental.pallas import tpu as pltpu

_BN_EPS = 1e-5


# ---------------------------------------------------------------------------
# Small helpers
# ---------------------------------------------------------------------------
def fold_bn(bn):
    gamma, beta, mean, var = bn
    scale = gamma / jnp.sqrt(var + _BN_EPS)
    bias = beta - mean * scale
    return (scale.reshape(1, -1).astype(jnp.float32),
            bias.reshape(1, -1).astype(jnp.float32))


def _const_spec(arr):
    """Whole-array VMEM block, constant index map, SINGLE-buffered.

    Constant blocks are only fetched once, so double-buffering them just wastes
    VMEM (wd alone is ~28 MiB at Cin=2048/Cout=256 bf16 -> must be single-
    buffered to fit v7x's 64 MiB VMEM)."""
    nd = arr.ndim
    return pl.BlockSpec(arr.shape, lambda *_: (0,) * nd,
                        pipeline_mode=pl.Buffered(1))


def _vmem_cap_bytes():
    try:
        return int(pltpu.get_tpu_info().vmem_capacity_bytes)
    except Exception:
        return 64 << 20          # conservative (v7x per-TC) default


def _vmem_limit_bytes():
    # Leave >=25% headroom for compiler-managed temporaries (the (th*w, Cout)
    # f32 accumulators, output double-buffer, etc.).
    return max(32 << 20, int(_vmem_cap_bytes() * 0.75))


def _auto_tile_h(H, W, Cin, dmax, cd):
    """Pick the H-tile so the double-buffered halo window uses ~40% of VMEM,
    floored at max(32, 2*dmax) rows so MXU M stays large and halo re-read
    amplification stays small (review: the old 4 MiB budget collapsed to 1)."""
    itemsize = jnp.dtype(cd).itemsize
    row_bytes = (W + 2 * dmax) * Cin * itemsize
    budget = int(_vmem_cap_bytes() * 0.4)
    th = budget // (2 * max(row_bytes, 1)) - 2 * dmax
    th = max(th, min(H, max(32, 2 * dmax)))
    th = min(th, H)
    # TODO(synk): for very wide rows / very large Cin also tile W and/or Cin
    # (with an accumulation grid axis) instead of relying on the floor alone.
    return int(th)


# ---------------------------------------------------------------------------
# Kernel 1: global-average-pool branch, pre-multiplied by its projection slice.
#   grid = (N, H-tiles); tiled reduction into a VMEM accumulator, then
#   mean -> 1x1 conv -> ReLU -> @ wp[pool slice] (already * proj-BN scale)
#   ==> (N, 1, Cout) f32.  Reads the padded input (zeros don't change the sum;
#   we divide by the true H*W).
# ---------------------------------------------------------------------------
def _pool_branch_kernel(x_ref, wpool_ref, wproj_ref, o_ref, acc_ref, *, inv_hw):
    t = pl.program_id(1)

    @pl.when(t == 0)
    def _init():
        acc_ref[...] = jnp.zeros_like(acc_ref)

    xs = x_ref[...].astype(jnp.float32)                  # (1, th, Wp, Cin)
    rows = xs.shape[0] * xs.shape[1] * xs.shape[2]
    cin = xs.shape[3]
    acc_ref[...] += jnp.sum(xs.reshape(rows, cin), axis=0, keepdims=True)

    @pl.when(t == pl.num_programs(1) - 1)
    def _finalize():
        wpool = wpool_ref[...]
        mean = (acc_ref[...] * inv_hw).astype(wpool.dtype)             # (1, Cin)
        y = jnp.maximum(
            jnp.dot(mean, wpool, preferred_element_type=jnp.float32), 0.0)
        yproj = jnp.dot(y.astype(wproj_ref.dtype), wproj_ref[...],
                        preferred_element_type=jnp.float32)            # (1, Cout)
        o_ref[...] = yproj.reshape(1, 1, -1)


def pool_branch_proj(x_pad, w_pool, w_proj_pool, *, true_hw, tile_rows):
    N, Hp, Wp, Cin = x_pad.shape
    Cout = w_pool.shape[1]
    assert Hp % tile_rows == 0, (Hp, tile_rows)
    grid = (N, Hp // tile_rows)
    kern = partial(_pool_branch_kernel, inv_hw=1.0 / float(true_hw))
    return pl.pallas_call(
        kern,
        out_shape=jax.ShapeDtypeStruct((N, 1, Cout), jnp.float32),
        grid=grid,
        in_specs=[
            pl.BlockSpec((1, tile_rows, Wp, Cin), lambda n, t: (n, t, 0, 0)),
            _const_spec(w_pool),
            _const_spec(w_proj_pool),
        ],
        out_specs=pl.BlockSpec((1, 1, Cout), lambda n, t: (n, 0, 0)),
        scratch_shapes=[pltpu.VMEM((1, Cin), jnp.float32)],
        compiler_params=pltpu.CompilerParams(
            dimension_semantics=("parallel", "arbitrary")),
    )(x_pad, w_pool, w_proj_pool)


# ---------------------------------------------------------------------------
# Kernel 2: fused ASPP branches + projection, one spatial tile per grid step.
#   grid = (N, T).  The padded input stays in HBM (pl.ANY); each step consumes
#   a (tile_h + 2*dmax, Wp, Cin) halo window from a DOUBLE-BUFFERED VMEM
#   scratch while the next tile's window is prefetched, computes the four conv
#   branches (+ folded-BN bias + ReLU), projects each with its slice of the
#   projection weight (BN scale already folded in), adds the per-image pooled
#   contribution and the projection bias, applies ReLU and stores the tile.
# ---------------------------------------------------------------------------
def _fused_aspp_kernel(x_hbm, w1_ref, wd_ref, bnb_ref, wp_ref, pool_ref,
                       fb_ref, o_ref, xh_ref, sem_ref,
                       *, dilations, tile_h, out_w, dmax):
    n = pl.program_id(0)
    t = pl.program_id(1)
    nt = pl.num_programs(1)
    th, w = tile_h, out_w
    thh = th + 2 * dmax

    def start_fetch(tt, slot):
        row0 = pl.multiple_of(tt * th, th)
        pltpu.make_async_copy(x_hbm.at[n, pl.ds(row0, thh)],
                              xh_ref.at[slot], sem_ref.at[slot]).start()

    slot = t % 2

    # Prime the pipeline for the first tile of this image (one exposed DMA per
    # image; later tiles are prefetched and overlap compute).
    @pl.when(t == 0)
    def _prime():
        start_fetch(0, 0)

    # Wait for the current tile's halo window ...
    row0 = pl.multiple_of(t * th, th)
    pltpu.make_async_copy(x_hbm.at[n, pl.ds(row0, thh)],
                          xh_ref.at[slot], sem_ref.at[slot]).wait()

    # ... and immediately prefetch the next tile of the SAME image into the
    # other buffer (staying within the image keeps the n axis megacore-safe).
    @pl.when(t + 1 < nt)
    def _prefetch():
        start_fetch(t + 1, 1 - slot)

    xh = xh_ref[slot]                            # (thh, Wp, Cin), compute dtype
    cin = xh.shape[-1]
    cout = o_ref.shape[-1]
    cd = xh.dtype

    # Center column window (kw == 1 for every dilation, and the 1x1 branch) is
    # materialized once and reused: 7 column relayouts / tile instead of 28.
    center = xh[:, dmax:dmax + w, :].reshape(thh * w, cin)

    # --- branch 0: 1x1 conv (BN scale folded into w1) + bias + ReLU, projected
    interior = center[dmax * w:(dmax + th) * w]
    y = jnp.maximum(
        jnp.dot(interior, w1_ref[...], preferred_element_type=jnp.float32)
        + bnb_ref[0], 0.0)
    proj = jnp.dot(y.astype(cd), wp_ref[0], preferred_element_type=jnp.float32)

    # --- branches 1..3: 3x3 dilated conv + bias + ReLU, projected & summed ---
    for bi, d in enumerate(dilations):
        off = dmax - d
        acc = None
        for kw in range(3):
            c0 = off + kw * d
            cols = center if kw == 1 else \
                xh[:, c0:c0 + w, :].reshape(thh * w, cin)
            for kh in range(3):
                r0 = off + kh * d
                rows = cols[r0 * w:(r0 + th) * w]       # contiguous row slice
                contrib = jnp.dot(rows, wd_ref[bi * 9 + kh * 3 + kw],
                                  preferred_element_type=jnp.float32)
                acc = contrib if acc is None else acc + contrib
        y = jnp.maximum(acc + bnb_ref[bi + 1], 0.0)
        proj = proj + jnp.dot(y.astype(cd), wp_ref[bi + 1],
                              preferred_element_type=jnp.float32)

    # --- epilogue: pooled contribution + projection bias + ReLU ---------------
    out = jnp.maximum(proj + pool_ref[0] + fb_ref[...], 0.0)
    o_ref[...] = out.reshape(1, th, w, cout).astype(o_ref.dtype)


def fused_aspp_project(x_pad, w1, wd, bnb, wp_br, pool_proj, fb, *,
                       dilations, out_h_tiles, out_w, tile_h, dmax,
                       out_dtype=jnp.float32):
    N, Hp, Wp, Cin = x_pad.shape
    Cout = w1.shape[1]
    th = tile_h
    assert out_h_tiles % th == 0, (out_h_tiles, th)
    thh = th + 2 * dmax
    grid = (N, out_h_tiles // th)
    kern = partial(_fused_aspp_kernel, dilations=tuple(dilations),
                   tile_h=th, out_w=out_w, dmax=dmax)
    # TODO(synk): for very large Cin (e.g. 2048 on v7x) add a Cin reduction grid
    # axis / stream wd per branch so the full 27*Cin*Cout weight block never has
    # to be VMEM-resident at once.
    return pl.pallas_call(
        kern,
        out_shape=jax.ShapeDtypeStruct((N, out_h_tiles, out_w, Cout), out_dtype),
        grid=grid,
        in_specs=[
            pl.BlockSpec(memory_space=pl.ANY),     # padded input stays in HBM
            _const_spec(w1),                       # (Cin, Cout)      * bn scale
            _const_spec(wd),                       # (27, Cin, Cout)  * bn scale
            _const_spec(bnb),                      # (4, 1, Cout) biases
            _const_spec(wp_br),                    # (4, Cout, Cout)  * proj scale
            pl.BlockSpec((1, 1, Cout), lambda n, t: (n, 0, 0)),  # pooled proj
            _const_spec(fb),                       # (1, Cout) proj bias
        ],
        out_specs=pl.BlockSpec((1, th, out_w, Cout), lambda n, t: (n, t, 0, 0)),
        scratch_shapes=[
            pltpu.VMEM((2, thh, Wp, Cin), x_pad.dtype),   # double-buffered halo
            pltpu.SemaphoreType.DMA((2,)),
        ],
        compiler_params=pltpu.CompilerParams(
            dimension_semantics=("parallel", "arbitrary"),
            vmem_limit_bytes=_vmem_limit_bytes()),
    )(x_pad, w1, wd, bnb, wp_br, pool_proj, fb)


# ---------------------------------------------------------------------------
# Full ASPP forward.  Input / output are NCHW (PyTorch convention).
# ---------------------------------------------------------------------------
def aspp_forward_pallas(x_nchw, params, atrous_rates, *, tile_h=None,
                        compute_dtype=jnp.bfloat16, out_dtype=jnp.float32):
    x = jnp.transpose(x_nchw, (0, 2, 3, 1))                       # NHWC
    N, H, W, Cin = x.shape
    Cout = params["w1"].shape[0]
    rates = tuple(atrous_rates)
    dmax = max(rates)
    cd = compute_dtype

    # ---- tiling: VMEM-budgeted tile, ragged H handled by padding up ----------
    if tile_h is None:
        th = _auto_tile_h(H, W, Cin, dmax, cd)
    else:
        th = max(1, min(int(tile_h), H))
    n_tiles = -(-H // th)
    H_t = n_tiles * th                           # tile-aligned output height

    # Single shared zero-pad with the maximum dilation; the bottom is padded a
    # little further so both the fused halo windows and the pool tiles always
    # stay in bounds (extra zero rows don't change conv padding semantics or
    # the global-average sum, and the extra output rows are sliced off).
    # TODO(synk): fuse the transpose+cast+pad into the pool kernel (or read the
    # unpadded input with a clamped halo DMA) to drop one HBM pass over x.
    itemsize = jnp.dtype(cd).itemsize
    Wp = W + 2 * dmax
    Hp_needed = H_t + 2 * dmax
    pool_rows = max(1, min(Hp_needed, (8 << 20) // max(Wp * Cin * itemsize, 1)))
    Hp = -(-Hp_needed // pool_rows) * pool_rows
    x_pad = jnp.pad(x.astype(cd),
                    ((0, 0), (dmax, Hp - H - dmax), (dmax, dmax), (0, 0)))

    # ---- fold BatchNorm: scales go into the weights, biases stay in-kernel ---
    s_list, b_list = [], []
    for kname in ("bn1", "bn2", "bn3", "bn4"):
        s, b = fold_bn(params[kname])
        s_list.append(s)
        b_list.append(b)
    bnb = jnp.stack(b_list)                      # (4, 1, Cout) branch biases
    fs, fb = fold_bn(params["bn_proj"])          # (1, Cout) each

    w1 = (params["w1"][:, :, 0, 0].T * s_list[0]).astype(cd)        # (Cin, Cout)
    wd_list = []
    for idx, k in enumerate(("w2", "w3", "w4")):
        wk = jnp.transpose(params[k], (2, 3, 1, 0))                 # (3,3,Cin,Cout)
        wd_list.append(wk * s_list[idx + 1].reshape(1, 1, 1, -1))
    wd = jnp.stack(wd_list).reshape(3 * 9, Cin, Cout).astype(cd)    # (27,Cin,Cout)
    w_pool = params["w_pool"][:, :, 0, 0].T.astype(cd)              # (Cin, Cout)
    wp = params["w_proj"][:, :, 0, 0].T.reshape(5, Cout, Cout)
    wp = (wp * fs.reshape(1, 1, -1)).astype(cd)   # proj-BN scale folded in

    # ---- pooled branch -> already multiplied by its (scaled) projection slice
    pool_proj = pool_branch_proj(x_pad, w_pool, wp[4],
                                 true_hw=H * W, tile_rows=pool_rows)

    out_nhwc = fused_aspp_project(x_pad, w1, wd, bnb, wp[:4], pool_proj, fb,
                                  dilations=rates, out_h_tiles=H_t, out_w=W,
                                  tile_h=th, dmax=dmax, out_dtype=out_dtype)
    out_nhwc = out_nhwc[:, :H]                   # drop the ragged-tile rows
    return jnp.transpose(out_nhwc, (0, 3, 1, 2))                    # NCHW


# ---------------------------------------------------------------------------
# Parameter construction (matches the PyTorch module's shapes).
# ---------------------------------------------------------------------------
def make_params(key, in_ch, out_ch):
    ks = jax.random.split(key, 16)

    def conv_w(k, shape):
        return (0.1 * jax.random.normal(k, shape)).astype(jnp.float32)

    def bn_p(k, c):
        k1, k2, k3, k4 = jax.random.split(k, 4)
        gamma = 1.0 + 0.1 * jax.random.normal(k1, (c,))
        beta = 0.1 * jax.random.normal(k2, (c,))
        mean = 0.1 * jax.random.normal(k3, (c,))
        var = 0.5 + jax.random.uniform(k4, (c,))
        return (gamma.astype(jnp.float32), beta.astype(jnp.float32),
                mean.astype(jnp.float32), var.astype(jnp.float32))

    return {
        "w1": conv_w(ks[0], (out_ch, in_ch, 1, 1)),        # OIHW
        "bn1": bn_p(ks[1], out_ch),
        "w2": conv_w(ks[2], (out_ch, in_ch, 3, 3)),
        "bn2": bn_p(ks[3], out_ch),
        "w3": conv_w(ks[4], (out_ch, in_ch, 3, 3)),
        "bn3": bn_p(ks[5], out_ch),
        "w4": conv_w(ks[6], (out_ch, in_ch, 3, 3)),
        "bn4": bn_p(ks[7], out_ch),
        "w_pool": conv_w(ks[8], (out_ch, in_ch, 1, 1)),
        "w_proj": conv_w(ks[9], (out_ch, 5 * out_ch, 1, 1)),
        "bn_proj": bn_p(ks[10], out_ch),
    }


# ---------------------------------------------------------------------------
# Pure-JAX reference (mirrors the PyTorch module in eval mode).
# ---------------------------------------------------------------------------
def aspp_forward_reference(x, params, atrous_rates):
    def conv(x, w, dilation=1, padding=0):
        return jax.lax.conv_general_dilated(
            x, w, (1, 1), [(padding, padding), (padding, padding)],
            rhs_dilation=(dilation, dilation),
            dimension_numbers=("NCHW", "OIHW", "NCHW"))

    def bn(x, p):
        gamma, beta, mean, var = p
        inv = gamma / jnp.sqrt(var + _BN_EPS)
        return (x - mean[None, :, None, None]) * inv[None, :, None, None] \
            + beta[None, :, None, None]

    relu = jax.nn.relu
    N, _, H, W = x.shape

    outs = [relu(bn(conv(x, params["w1"]), params["bn1"]))]
    for rate, wk, bnk in zip(atrous_rates, ("w2", "w3", "w4"),
                             ("bn2", "bn3", "bn4")):
        outs.append(relu(bn(conv(x, params[wk], dilation=rate, padding=rate),
                            params[bnk])))
    pooled = jnp.mean(x, axis=(2, 3), keepdims=True)              # (N,Cin,1,1)
    pooled = relu(conv(pooled, params["w_pool"]))                 # (N,Cout,1,1)
    outs.append(jnp.broadcast_to(pooled, (N, pooled.shape[1], H, W)))

    cat = jnp.concatenate(outs, axis=1)
    proj = relu(bn(conv(cat, params["w_proj"]), params["bn_proj"]))
    return proj  # Dropout(0.5) is identity in eval mode


# ---------------------------------------------------------------------------
if __name__ == "__main__":
    key = jax.random.PRNGKey(0)
    k_x, k_p = jax.random.split(key)

    N, Cin, H, W = 2, 4, 16, 16
    Cout = 8
    atrous_rates = (2, 4, 6)

    x = jax.random.normal(k_x, (N, Cin, H, W), dtype=jnp.float32)
    params = make_params(k_p, Cin, Cout)

    ref = jax.block_until_ready(aspp_forward_reference(x, params, atrous_rates))

    # f32 MXU path, tile_h=8 -> 2 H-tiles/image: exercises the halo DMA
    # double-buffering + prefetch path with exact arithmetic.
    out_f32 = jax.block_until_ready(
        aspp_forward_pallas(x, params, atrous_rates, tile_h=8,
                            compute_dtype=jnp.float32))
    assert out_f32.shape == (N, Cout, H, W), out_f32.shape
    np.testing.assert_allclose(np.asarray(out_f32), np.asarray(ref),
                               rtol=1e-3, atol=1e-3)

    # f32, tile_h=6 -> ragged H (16 = 2*6 + 4): exercises the padded-tail path.
    out_rag = jax.block_until_ready(
        aspp_forward_pallas(x, params, atrous_rates, tile_h=6,
                            compute_dtype=jnp.float32))
    np.testing.assert_allclose(np.asarray(out_rag), np.asarray(ref),
                               rtol=1e-3, atol=1e-3)

    # bf16 MXU path (2x MXU throughput, half the HBM traffic) with auto tiling.
    out_bf16 = jax.block_until_ready(
        aspp_forward_pallas(x, params, atrous_rates,
                            compute_dtype=jnp.bfloat16))
    np.testing.assert_allclose(np.asarray(out_bf16), np.asarray(ref),
                               rtol=3e-2, atol=3e-2)

    print("KERNEL_OK")
</pallas_src>

<mosaic_0001>
module attributes {stable_mosaic.version = 11 : i64} {
  func.func @_pool_branch_kernel(%arg0: i32, %arg1: i32, %arg2: memref<1x28x28x4xf32, #tpu.memory_space<vmem>>, %arg3: memref<4x8xf32, #tpu.memory_space<vmem>>, %arg4: memref<8x8xf32, #tpu.memory_space<vmem>>, %arg5: memref<1x1x8xf32, #tpu.memory_space<vmem>>, %arg6: memref<1x4xf32, #tpu.memory_space<vmem>>) attributes {dimension_semantics = [#tpu.dimension_semantics<parallel>, #tpu.dimension_semantics<arbitrary>], iteration_bounds = array<i64: 2, 1>, scalar_prefetch = 0 : i64, scratch_operands = 1 : i64, tpu.core_type = #tpu.core_type<tc>, window_params = [{transform_indices = @transform_0, window_bounds = array<i64: 1, 28, 28, 4>}, {pipeline_mode = #tpu.pipeline_mode<synchronous>, transform_indices = @transform_1, window_bounds = array<i64: 4, 8>}, {pipeline_mode = #tpu.pipeline_mode<synchronous>, transform_indices = @transform_2, window_bounds = array<i64: 8, 8>}, {transform_indices = @transform_3, window_bounds = array<i64: 1, 1, 8>}]} {
    %c0_i32 = arith.constant 0 : i32
    %0 = arith.cmpi eq, %arg1, %c0_i32 : i32
    %1 = arith.extui %0 : i1 to i32
    %c0_i32_0 = arith.constant 0 : i32
    %2 = arith.cmpi ne, %1, %c0_i32_0 : i32
    scf.if %2 {
      %cst_10 = arith.constant 0.000000e+00 : f32
      %13 = vector.broadcast %cst_10 : f32 to vector<1x4xf32>
      %c0_11 = arith.constant 0 : index
      %c0_12 = arith.constant 0 : index
      %14 = vector.load %arg6[%c0_11, %c0_12] : memref<1x4xf32, #tpu.memory_space<vmem>>, vector<1x4xf32>
      tpu.vector_store %arg6[%c0_11, %c0_12], %13 {strides = array<i32>} : memref<1x4xf32, #tpu.memory_space<vmem>>, vector<1x4xf32>,
    } else {
    }
    %c0 = arith.constant 0 : index
    %c0_1 = arith.constant 0 : index
    %c0_2 = arith.constant 0 : index
    %c0_3 = arith.constant 0 : index
    %3 = vector.load %arg2[%c0, %c0_1, %c0_2, %c0_3] : memref<1x28x28x4xf32, #tpu.memory_space<vmem>>, vector<1x28x28x4xf32>
    %c0_4 = arith.constant 0 : index
    %c0_5 = arith.constant 0 : index
    %4 = vector.load %arg6[%c0_4, %c0_5] : memref<1x4xf32, #tpu.memory_space<vmem>>, vector<1x4xf32>
    %5 = vector.shape_cast %3 : vector<1x28x28x4xf32> to vector<784x4xf32>
    %cst = arith.constant dense<0.000000e+00> : vector<4xf32>
    %6 = vector.multi_reduction <add>, %5, %cst [0] : vector<784x4xf32> to vector<4xf32>
    %7 = vector.shape_cast %6 : vector<4xf32> to vector<1x4xf32>
    %8 = arith.addf %4, %7 : vector<1x4xf32>
    %c0_6 = arith.constant 0 : index
    %c0_7 = arith.constant 0 : index
    %9 = vector.load %arg6[%c0_6, %c0_7] : memref<1x4xf32, #tpu.memory_space<vmem>>, vector<1x4xf32>
    tpu.vector_store %arg6[%c0_6, %c0_7], %8 {strides = array<i32>} : memref<1x4xf32, #tpu.memory_space<vmem>>, vector<1x4xf32>,
    %c0_i32_8 = arith.constant 0 : i32
    %10 = arith.cmpi eq, %arg1, %c0_i32_8 : i32
    %11 = arith.extui %10 : i1 to i32
    %c0_i32_9 = arith.constant 0 : i32
    %12 = arith.cmpi ne, %11, %c0_i32_9 : i32
    scf.if %12 {
      %c0_10 = arith.constant 0 : index
      %c0_11 = arith.constant 0 : index
      %13 = vector.load %arg3[%c0_10, %c0_11] : memref<4x8xf32, #tpu.memory_space<vmem>>, vector<4x8xf32>
      %c0_12 = arith.constant 0 : index
      %c0_13 = arith.constant 0 : index
      %14 = vector.load %arg6[%c0_12, %c0_13] : memref<1x4xf32, #tpu.memory_space<vmem>>, vector<1x4xf32>
      %cst_14 = arith.constant 3.906250e-03 : f32
      %15 = vector.broadcast %cst_14 : f32 to vector<1x4xf32>
      %16 = arith.mulf %14, %15 : vector<1x4xf32>
      %cst_15 = arith.constant dense<0.000000e+00> : vector<1x8xf32>
      %17 = tpu.matmul %16, %13, %cst_15 {dimension_numbers = #tpu.dot_dimension_numbers<[1], [0], [0], [1], [0, 0, 1, 1], [], []>} : vector<1x4xf32>, vector<4x8xf32>, vector<1x8xf32> -> vector<1x8xf32>
      %cst_16 = arith.constant 0.000000e+00 : f32
      %18 = vector.broadcast %cst_16 : f32 to vector<1x8xf32>
      %19 = arith.maximumf %17, %18 : vector<1x8xf32>
      %c0_17 = arith.constant 0 : index
      %c0_18 = arith.constant 0 : index
      %20 = vector.load %arg4[%c0_17, %c0_18] : memref<8x8xf32, #tpu.memory_space<vmem>>, vector<8x8xf32>
      %cst_19 = arith.constant dense<0.000000e+00> : vector<1x8xf32>
      %21 = tpu.matmul %19, %20, %cst_19 {dimension_numbers = #tpu.dot_dimension_numbers<[1], [0], [0], [1], [0, 0, 1, 1], [], []>} : vector<1x8xf32>, vector<8x8xf32>, vector<1x8xf32> -> vector<1x8xf32>
      %22 = vector.shape_cast %21 : vector<1x8xf32> to vector<1x1x8xf32>
      %c0_20 = arith.constant 0 : index
      %c0_21 = arith.constant 0 : index
      %c0_22 = arith.constant 0 : index
      %23 = vector.load %arg5[%c0_20, %c0_21, %c0_22] : memref<1x1x8xf32, #tpu.memory_space<vmem>>, vector<1x1x8xf32>
      tpu.vector_store %arg5[%c0_20, %c0_21, %c0_22], %22 {strides = array<i32>} : memref<1x1x8xf32, #tpu.memory_space<vmem>>, vector<1x1x8xf32>,
    } else {
    }
    return
  }
  func.func @transform_0(%arg0: i32, %arg1: i32) -> (i32, i32, i32, i32) {
    %c0_i32 = arith.constant 0 : i32
    %c0_i32_0 = arith.constant 0 : i32
    %c0_i32_1 = arith.constant 0 : i32
    return %arg0, %arg1, %c0_i32, %c0_i32_0 : i32, i32, i32, i32
  }
  func.func @transform_1(%arg0: i32, %arg1: i32) -> (i32, i32) {
    %c0_i32 = arith.constant 0 : i32
    %c0_i32_0 = arith.constant 0 : i32
    %c0_i32_1 = arith.constant 0 : i32
    return %c0_i32, %c0_i32_0 : i32, i32
  }
  func.func @transform_2(%arg0: i32, %arg1: i32) -> (i32, i32) {
    %c0_i32 = arith.constant 0 : i32
    %c0_i32_0 = arith.constant 0 : i32
    %c0_i32_1 = arith.constant 0 : i32
    return %c0_i32, %c0_i32_0 : i32, i32
  }
  func.func @transform_3(%arg0: i32, %arg1: i32) -> (i32, i32, i32) {
    %c0_i32 = arith.constant 0 : i32
    %c0_i32_0 = arith.constant 0 : i32
    %c0_i32_1 = arith.constant 0 : i32
    return %arg0, %c0_i32, %c0_i32_0 : i32, i32, i32
  }
}

</mosaic_0001>

<bundles_post_ra>
// kernel: tpu_custom_call.1
= control target key start
LH: loop header
LB: loop body
LE: loop exit
PB: predicated region body
PF: predicated region fallthrough
CT: control target
= control target key end

     0   :  { %8 = vsyncpa [#allocation4], 0  ;;  %s1781_s0 = inlined_call_operand.vmem [shape: f32[2,28,28,4], index: 0, kind: input, shape index: {}]   ;;  %s1782_s1 = inlined_call_operand.vmem [shape: f32[4,8], index: 1, kind: input, shape index: {}]   ;;  %s1783_s2 = inlined_call_operand.vmem [shape: f32[8,8], index: 2, kind: input, shape index: {}]   ;;  %s1784_s3 = inlined_call_operand.hbm [shape: f32[2,1,8], index: 3, kind: output, shape index: {}]  }
   0x1   :  { %10 = vsyncpa [#allocation4 + $0x1], 0  ;;  %s1444_s12 = smov 0   ;;  %s1446_s13 = smov 0  }
   0x2   :  { %s1448_s14 = smov 0   ;;  %s1450_s15 = smov 0  }
   0x3   :  { %s1452_s16 = smov 0   ;;  %s1454_s17 = smov 0  }
   0x4 LB: > { %s1161_s18 = sadd.s32 4294967295, %s1419_s17   ;;  %s1162_s19 = sadd.s32 4294967294, %s1419_s17   ;;  %s1419_s17 = sphi %s1454_s17, %s16_s17   ;;  %s1415_s16 = sphi %s1452_s16, %s1791_s16   ;;  %s1411_s15 = sphi %s1450_s15, %s1790_s15   ;;  %s1407_s14 = sphi %s1448_s14, %s1789_s14   ;;  %s1403_s13 = sphi %s1446_s13, %s1788_s13   ;;  %s1399_s12 = sphi %s1444_s12, %s1787_s12  }
   0x5   : > { %s28_s20 = sadd.s32 1, %s1415_s16  ;;  %s105_s21 = sadd.s32 1, %s1407_s14 }
   0x6   : > { %p30_p0 = scmp.ge.s32.totalorder %s28_s20, 2  ;;  %p115_p1 = scmp.ne.s32.totalorder %s1407_s14, %s1403_s13 }
   0x7   : > { %p116_p2 = scmp.eq.s32.totalorder %s1161_s18, 1  ;;  %p121_p3 = scmp.ne.s32.totalorder %s1403_s13, %s1399_s12 }
   0x8   : > { %s1793_s20 = smov (%p30_p0, %s28_s20), 0  ;;  %p122_p5 = scmp.eq.s32.totalorder %s1162_s19, 1 }
   0x9   : > { %p1484_p4 = por %p116_p2, %p115_p1  ;;  %s102_s23 = ssub.s32 %s1415_s16, %s1793_s20 }
   0xa   : > { %p1165_p6 = scmp.ge.s32.totalorder %s1419_s17, 1  ;;  %p103_p7 = scmp.eq.s32.totalorder %s102_s23, 0 }
   0xb   : > { %p1491_p8 = por %p122_p5, %p121_p3  ;;  %p160_p9 = scmp.lt.s32.totalorder %s1419_s17, 3 }
   0xc   : > { %s1497_s25 = scalar_select %p103_p7, %s1407_s14, %s105_s21  }
   0xd   : > { %p161_p10 = pnand %p1165_p6, %p160_p9 }
   0xe   : > { %p189_p11 = scmp.lt.s32.totalorder (!%p161_p10), %s1411_s15, 1  ;;  %s186_s8 = sand.u32 (!%p161_p10), 1, %s1403_s13  }
   0xf   : > { %164 = sbr.rel (%p161_p10) target bundleno = 651 (0x28b), region = 32  ;;  %s1170_s9 = sshll.u32 (!%p161_p10), %s1411_s15, 4 }
  0x10   : > { %s187_s10 = scalar_lea.vmem (!%p161_p10), [#allocation3], %s186_s8  ;;  %s1735_s21 = scalar_lea.hbm (!%p161_p10), %s1784_s3, %s1170_s9 }
  0x11   : > { %s1089_s11 = sshll.u32 (!%p161_p10), %s187_s10, 4  ;;  %s1077_s23 = scalar_lea.sflag (!%p161_p10), [#allocation4], %s186_s8  ;;  %s1737_s11 = int_to_ptr.vmem [resolvable:$true] %s1089_s11 }
  0x14   : > { %vm203_vm0 = vcmask 24576   ;;  %v1421_v0 = vmov 0.0   ;;  %s190_s26 = scalar_select %p189_p11, %s1411_s15, 1  ;;  %vm710_vm1 = vcmask 31744   ;;  %vm924_vm2 = vcmask 1043456  }
  0x15   : > { %204 = vst.msk [vmem:[#allocation2] sm:$0x1] %vm203_vm0, %v1421_v0  ;;  %1177 = vmatprep.subr.mxu0 %v1421_v0  ;;  %1182 = vmatprep.subr.mxu1 %v1421_v0  ;;  %vm1422_vm3 = vmmov 0   ;;  %vm1000_vm4 = vcmask 64512   ;;  %vm1074_vm5 = vcmask 57344   ;;  %s1423_s15 = smov [#allocation3]  }
  0x16   : > { %s1187_s27 = smul.u32 896, %s190_s26  ;;  %1179 = vmatprep.mubr.msk.f32.mxu0 %vm1422_vm3, %v1421_v0  ;;  %1184 = vmatprep.mubr.msk.f32.mxu1 %vm1422_vm3, %v1421_v0  ;;  %s1343_s26 = scalar_lea.vmem %s1737_s11, 16 }
  0x17   : > { %p1344_p12 = scmp.ne.s32.totalorder %s1737_s11, %s1343_s26 }
  0x18   : > { %s1508_s30 = scalar_lea.vmem %s1781_s0, %s1187_s27  ;;  %s1347_s27 = sshll.u32 %s1423_s15, 4  ;;  %s1348_s27 = int_to_ptr.vmem [resolvable:$false] %s1347_s27 }
  0x19   : > { %v205_v1 = vld [vmem:[%s1508_s30] sm:$0xff]  ;;  %v206_v2 = vld [vmem:[%s1508_s30 + $0x8] sm:$0xff]  ;;  %v207_v3 = vld [vmem:[%s1508_s30 + $0x10] sm:$0xff]  ;;  %p1345_p13 = pnand %p1344_p12, %p1484_p4  ;;  %s1349_s28 = scalar_lea.vmem %s1348_s27, 32 }
  0x1a   : > { %v430_v4 = vcombine.high %v205_v1, %v205_v1  ;;  %v431_v5 = vcombine.high %v206_v2, %v206_v2  ;;  %v432_v6 = vcombine.high %v207_v3, %v207_v3  ;;  %v209_v7 = vld [vmem:[%s1508_s30 + $0x20] sm:$0xff]  ;;  %v208_v8 = vld [vmem:[%s1508_s30 + $0x18] sm:$0xf]  ;;  %v210_v9 = vld [vmem:[%s1508_s30 + $0x28] sm:$0xff]  ;;  %p1350_p1 = scmp.lt.s32.totalorder %s1737_s11, %s1348_s27  ;;  %p1351_p2 = scmp.lt.s32.totalorder %s1349_s28, %s1343_s26 }
  0x1b   : > { %v211_v10 = vld [vmem:[%s1508_s30 + $0x30] sm:$0xff]  ;;  %v433_v11 = vcombine.high %v209_v7, %v209_v7  ;;  %v434_v15 = vcombine.high %v210_v9, %v210_v9  ;;  %v517_v16 = vcombine.low %v208_v8, %v209_v7  ;;  %v213_v17 = vld [vmem:[%s1508_s30 + $0x40] sm:$0xff]  ;;  %v212_v23 = vld [vmem:[%s1508_s30 + $0x38] sm:$0xf]  ;;  %p1346_p0 = pneg %p1345_p13 }
  0x1c   : > { %v514_v12 = vcombine.low %v205_v1, %v430_v4  ;;  %v515_v13 = vcombine.low %v206_v2, %v431_v5  ;;  %v516_v14 = vcombine.low %v207_v3, %v432_v6  ;;  %v435_v18 = vcombine.high %v211_v10, %v211_v10  ;;  %v214_v24 = vld [vmem:[%s1508_s30 + $0x48] sm:$0xff]  ;;  %v215_v29 = vld [vmem:[%s1508_s30 + $0x50] sm:$0xff]  ;;  %v217_v38 = vld [vmem:[%s1508_s30 + $0x60] sm:$0xff]  ;;  %p1352_p3 = por %p1351_p2, %p1350_p1 }
  0x1d   : > { %v518_v19 = vcombine.low %v433_v11, %v210_v9  ;;  %v436_v26 = vcombine.high %v213_v17, %v213_v17  ;;  %v519_v27 = vcombine.low %v434_v15, %v211_v10  ;;  %v716_v28 = vsel %vm710_vm1, %v517_v16, 0.0  ;;  %v216_v42 = vld [vmem:[%s1508_s30 + $0x58] sm:$0xf]  ;;  %v218_v43 = vld [vmem:[%s1508_s30 + $0x68] sm:$0xff]  ;;  %v219_v48 = vld [vmem:[%s1508_s30 + $0x70] sm:$0xff] }
  0x1e   : > { %v711_v20 = vsel %vm710_vm1, %v514_v12, 0.0  ;;  %v712_v21 = vsel %vm710_vm1, %v515_v13, 0.0  ;;  %v714_v22 = vsel %vm710_vm1, %v516_v14, 0.0  ;;  %v437_v31 = vcombine.high %v214_v24, %v214_v24  ;;  %v221_v53 = vld [vmem:[%s1508_s30 + $0x80] sm:$0xff]  ;;  %v220_v58 = vld [vmem:[%s1508_s30 + $0x78] sm:$0xf]  ;;  %p1353_p5 = pnand %p1352_p3, %p1346_p0 }
  0x1f   : > { %v713_v25 = vadd.f32 %v712_v21, %v711_v20  ;;  %v520_v32 = vcombine.low %v435_v18, %v212_v23  ;;  %v718_v33 = vsel %vm710_vm1, %v518_v19, 0.0  ;;  %v438_v35 = vcombine.high %v215_v29, %v215_v29  ;;  %v222_v59 = vld [vmem:[%s1508_s30 + $0x88] sm:$0xff]  ;;  %v223_v1 = vld [vmem:[%s1508_s30 + $0x90] sm:$0xff]  ;;  %v225_v10 = vld [vmem:[%s1508_s30 + $0xa0] sm:$0xff] }
  0x20   : > { %v521_v36 = vcombine.low %v213_v17, %v436_v26  ;;  %v720_v37 = vsel %vm710_vm1, %v519_v27, 0.0  ;;  %v522_v40 = vcombine.low %v214_v24, %v437_v31  ;;  %v439_v45 = vcombine.high %v217_v38, %v217_v38  ;;  %v224_v14 = vld [vmem:[%s1508_s30 + $0x98] sm:$0xf]  ;;  %v226_v15 = vld [vmem:[%s1508_s30 + $0xa8] sm:$0xff]  ;;  %v227_v20 = vld [vmem:[%s1508_s30 + $0xb0] sm:$0xff] }
  0x21   : > { %v715_v30 = vadd.f32 %v714_v22, %v713_v25  ;;  %v722_v41 = vsel %vm710_vm1, %v520_v32, 0.0  ;;  %v523_v46 = vcombine.low %v215_v29, %v438_v35  ;;  %v440_v50 = vcombine.high %v218_v43, %v218_v43  ;;  %v229_v25 = vld [vmem:[%s1508_s30 + $0xc0] sm:$0xff]  ;;  %v230_v31 = vld [vmem:[%s1508_s30 + $0xc8] sm:$0xff] }
  0x22   : > { %v724_v47 = vsel %vm710_vm1, %v521_v36, 0.0  ;;  %v524_v51 = vcombine.low %v216_v42, %v217_v38  ;;  %v726_v52 = vsel %vm710_vm1, %v522_v40, 0.0  ;;  %v441_v55 = vcombine.high %v219_v48, %v219_v48  ;;  %v231_v36 = vld [vmem:[%s1508_s30 + $0xd0] sm:$0xff] }
  0x23   : > { %v717_v34 = vadd.f32 %v716_v28, %v715_v30  ;;  %v525_v56 = vcombine.low %v439_v45, %v218_v43  ;;  %v728_v57 = vsel %vm710_vm1, %v523_v46, 0.0  ;;  %v442_v61 = vcombine.high %v221_v53, %v221_v53  ;;  %v228_v30 = vld [vmem:[%s1508_s30 + $0xb8] sm:$0xf]  ;;  %v233_v45 = vld [vmem:[%s1508_s30 + $0xe0] sm:$0xff] }
  0x24   : > { %v526_v62 = vcombine.low %v440_v50, %v219_v48  ;;  %v730_v63 = vsel %vm710_vm1, %v524_v51, 0.0  ;;  %v443_v3 = vcombine.high %v222_v59, %v222_v59  ;;  %v527_v4 = vcombine.low %v441_v55, %v220_v58  ;;  %v234_v50 = vld [vmem:[%s1508_s30 + $0xe8] sm:$0xff]  ;;  %v235_v55 = vld [vmem:[%s1508_s30 + $0xf0] sm:$0xff] }
  0x25   : > { %v719_v39 = vadd.f32 %v718_v33, %v717_v34  ;;  %v732_v5 = vsel %vm710_vm1, %v525_v56, 0.0  ;;  %v444_v7 = vcombine.high %v223_v1, %v223_v1  ;;  %v528_v8 = vcombine.low %v221_v53, %v442_v61 }
  0x26   : > { %v734_v9 = vsel %vm710_vm1, %v526_v62, 0.0  ;;  %v529_v12 = vcombine.low %v222_v59, %v443_v3  ;;  %v736_v13 = vsel %vm710_vm1, %v527_v4, 0.0  ;;  %v445_v17 = vcombine.high %v225_v10, %v225_v10  ;;  %v238_v3 = vld [vmem:[%s1508_s30 + $0x108] sm:$0xff] }
  0x27   : > { %v721_v44 = vadd.f32 %v720_v37, %v719_v39  ;;  %v530_v18 = vcombine.low %v223_v1, %v444_v7  ;;  %v738_v19 = vsel %vm710_vm1, %v528_v8, 0.0  ;;  %v446_v22 = vcombine.high %v226_v15, %v226_v15  ;;  %v239_v8 = vld [vmem:[%s1508_s30 + $0x110] sm:$0xff] }
  0x28   : > { %v531_v23 = vcombine.low %v224_v14, %v225_v10  ;;  %v740_v24 = vsel %vm710_vm1, %v529_v12, 0.0  ;;  %v447_v27 = vcombine.high %v227_v20, %v227_v20  ;;  %v532_v28 = vcombine.low %v445_v17, %v226_v15  ;;  %v241_v17 = vld [vmem:[%s1508_s30 + $0x120] sm:$0xff] }
  0x29   : > { %v723_v49 = vadd.f32 %v722_v41, %v721_v44  ;;  %v742_v29 = vsel %vm710_vm1, %v530_v18, 0.0  ;;  %v448_v33 = vcombine.high %v229_v25, %v229_v25  ;;  %v533_v34 = vcombine.low %v446_v22, %v227_v20  ;;  %v242_v22 = vld [vmem:[%s1508_s30 + $0x128] sm:$0xff] }
  0x2a   : > { %v744_v35 = vsel %vm710_vm1, %v531_v23, 0.0  ;;  %v449_v38 = vcombine.high %v230_v31, %v230_v31  ;;  %v534_v39 = vcombine.low %v447_v27, %v228_v30  ;;  %v746_v40 = vsel %vm710_vm1, %v532_v28, 0.0  ;;  %v243_v27 = vld [vmem:[%s1508_s30 + $0x130] sm:$0xff] }
  0x2b   : > { %v725_v54 = vadd.f32 %v724_v47, %v723_v49  ;;  %v450_v42 = vcombine.high %v231_v36, %v231_v36  ;;  %v535_v43 = vcombine.low %v229_v25, %v448_v33  ;;  %v748_v44 = vsel %vm710_vm1, %v533_v34, 0.0  ;;  %v232_v49 = vld [vmem:[%s1508_s30 + $0xd8] sm:$0xf] }
  0x2c   : > { %v536_v47 = vcombine.low %v230_v31, %v449_v38  ;;  %v750_v48 = vsel %vm710_vm1, %v534_v39, 0.0  ;;  %v538_v58 = vcombine.low %v232_v49, %v233_v45  ;;  %v453_v62 = vcombine.high %v235_v55, %v235_v55  ;;  %v246_v38 = vld [vmem:[%s1508_s30 + $0x148] sm:$0xff] }
  0x2d   : > { %v727_v60 = vadd.f32 %v726_v52, %v725_v54  ;;  %v451_v52 = vcombine.high %v233_v45, %v233_v45  ;;  %v537_v53 = vcombine.low %v231_v36, %v450_v42  ;;  %v752_v54 = vsel %vm710_vm1, %v535_v43, 0.0  ;;  %v247_v43 = vld [vmem:[%s1508_s30 + $0x150] sm:$0xff] }
  0x2e   : > { %v754_v59 = vsel %vm710_vm1, %v536_v47, 0.0  ;;  %v758_v7 = vsel %vm710_vm1, %v538_v58, 0.0  ;;  %v455_v10 = vcombine.high %v238_v3, %v238_v3  ;;  %v456_v14 = vcombine.high %v239_v8, %v239_v8 }
  0x2f   : > { %v729_v2 = vadd.f32 %v728_v57, %v727_v60  ;;  %v452_v57 = vcombine.high %v234_v50, %v234_v50  ;;  %v237_v60 = vld [vmem:[%s1508_s30 + $0x100] sm:$0xff]  ;;  %v756_v1 = vsel %vm710_vm1, %v537_v53, 0.0  ;;  %v459_v34 = vcombine.high %v243_v27, %v243_v27 }
  0x30   : > { %v544_v25 = vcombine.low %v239_v8, %v456_v14  ;;  %v461_v45 = vcombine.high %v246_v38, %v246_v38  ;;  %v462_v49 = vcombine.high %v247_v43, %v247_v43 }
  0x31   : > { %v731_v6 = vadd.f32 %v730_v63, %v729_v2  ;;  %v539_v63 = vcombine.low %v451_v52, %v234_v50  ;;  %v236_v2 = vld [vmem:[%s1508_s30 + $0xf8] sm:$0xf]  ;;  %v249_v52 = vld [vmem:[%s1508_s30 + $0x160] sm:$0xff] }
  0x32   : > { %v770_v36 = vsel %vm710_vm1, %v544_v25, 0.0 }
  0x33   : > { %v733_v11 = vadd.f32 %v732_v5, %v731_v6  ;;  %v454_v5 = vcombine.high %v237_v60, %v237_v60  ;;  %v540_v6 = vcombine.low %v452_v57, %v235_v55  ;;  %v760_v12 = vsel %vm710_vm1, %v539_v63, 0.0  ;;  %v250_v57 = vld [vmem:[%s1508_s30 + $0x168] sm:$0xff] }
  0x35   : > { %v735_v16 = vadd.f32 %v734_v9, %v733_v11  ;;  %v541_v11 = vcombine.low %v453_v62, %v236_v2  ;;  %v542_v15 = vcombine.low %v237_v60, %v454_v5  ;;  %v551_v60 = vcombine.low %v247_v43, %v462_v49  ;;  %v251_v62 = vld [vmem:[%s1508_s30 + $0x170] sm:$0xff] }
  0x37   : > { %v737_v21 = vadd.f32 %v736_v13, %v735_v16  ;;  %v762_v16 = vsel %vm710_vm1, %v540_v6, 0.0  ;;  %v764_v20 = vsel %vm710_vm1, %v541_v11, 0.0  ;;  %v465_v6 = vcombine.high %v251_v62, %v251_v62 }
  0x38   : > { %v784_v8 = vsel %vm710_vm1, %v551_v60, 0.0 }
  0x39   : > { %v739_v26 = vadd.f32 %v738_v19, %v737_v21  ;;  %v543_v19 = vcombine.low %v238_v3, %v455_v10  ;;  %v240_v21 = vld [vmem:[%s1508_s30 + $0x118] sm:$0xf]  ;;  %v254_v10 = vld [vmem:[%s1508_s30 + $0x188] sm:$0xff] }
  0x3a   : > { %v545_v30 = vcombine.low %v240_v21, %v241_v17 }
  0x3b   : > { %v741_v32 = vadd.f32 %v740_v24, %v739_v26  ;;  %v457_v24 = vcombine.high %v241_v17, %v241_v17  ;;  %v766_v26 = vsel %vm710_vm1, %v542_v15, 0.0  ;;  %v768_v31 = vsel %vm710_vm1, %v543_v19, 0.0  ;;  %v255_v15 = vld [vmem:[%s1508_s30 + $0x190] sm:$0xff] }
  0x3c   : > { %v772_v42 = vsel %vm710_vm1, %v545_v30, 0.0  ;;  %v467_v17 = vcombine.high %v254_v10, %v254_v10  ;;  %v468_v21 = vcombine.high %v255_v15, %v255_v15 }
  0x3d   : > { %v743_v37 = vadd.f32 %v742_v29, %v741_v32  ;;  %v458_v29 = vcombine.high %v242_v22, %v242_v22  ;;  %v245_v32 = vld [vmem:[%s1508_s30 + $0x140] sm:$0xff] }
  0x3f   : > { %v745_v41 = vadd.f32 %v744_v35, %v743_v37  ;;  %v546_v35 = vcombine.low %v457_v24, %v242_v22  ;;  %v244_v37 = vld [vmem:[%s1508_s30 + $0x138] sm:$0xf]  ;;  %v257_v24 = vld [vmem:[%s1508_s30 + $0x1a0] sm:$0xff] }
  0x41   : > { %v747_v46 = vadd.f32 %v746_v40, %v745_v41  ;;  %v460_v40 = vcombine.high %v245_v32, %v245_v32  ;;  %v547_v41 = vcombine.low %v458_v29, %v243_v27  ;;  %v774_v47 = vsel %vm710_vm1, %v546_v35, 0.0  ;;  %v258_v29 = vld [vmem:[%s1508_s30 + $0x1a8] sm:$0xff] }
  0x43   : > { %v749_v51 = vadd.f32 %v748_v44, %v747_v46  ;;  %v548_v46 = vcombine.low %v459_v34, %v244_v37  ;;  %v549_v50 = vcombine.low %v245_v32, %v460_v40  ;;  %v558_v32 = vcombine.low %v255_v15, %v468_v21  ;;  %v259_v34 = vld [vmem:[%s1508_s30 + $0x1b0] sm:$0xff]  ;;  %v261_v40 = vld [vmem:[%s1508_s30 + $0x1c0] sm:$0xff] }
  0x44   : > { %v470_v37 = vcombine.high %v258_v29, %v258_v29 }
  0x45   : > { %v751_v56 = vadd.f32 %v750_v48, %v749_v51  ;;  %v776_v51 = vsel %vm710_vm1, %v547_v41, 0.0  ;;  %v778_v55 = vsel %vm710_vm1, %v548_v46, 0.0  ;;  %v262_v46 = vld [vmem:[%s1508_s30 + $0x1c8] sm:$0xff] }
  0x46   : > { %v561_v49 = vcombine.low %v470_v37, %v259_v34 }
  0x47   : > { %v753_v61 = vadd.f32 %v752_v54, %v751_v56  ;;  %v550_v54 = vcombine.low %v246_v38, %v461_v45  ;;  %v248_v56 = vld [vmem:[%s1508_s30 + $0x158] sm:$0xf] }
  0x48   : > { %v552_v2 = vcombine.low %v248_v56, %v249_v52  ;;  %v260_v45 = vld [vmem:[%s1508_s30 + $0x1b8] sm:$0xf] }
  0x49   : > { %v755_v4 = vadd.f32 %v754_v59, %v753_v61  ;;  %v463_v59 = vcombine.high %v249_v52, %v249_v52  ;;  %v780_v61 = vsel %vm710_vm1, %v549_v50, 0.0  ;;  %v782_v3 = vsel %vm710_vm1, %v550_v54, 0.0 }
  0x4a   : > { %v786_v14 = vsel %vm710_vm1, %v552_v2, 0.0 }
  0x4b   : > { %v757_v9 = vadd.f32 %v756_v1, %v755_v4  ;;  %v464_v1 = vcombine.high %v250_v57, %v250_v57  ;;  %v253_v4 = vld [vmem:[%s1508_s30 + $0x180] sm:$0xff] }
  0x4d   : > { %v759_v13 = vadd.f32 %v758_v7, %v757_v9  ;;  %v553_v7 = vcombine.low %v463_v59, %v250_v57  ;;  %v252_v9 = vld [vmem:[%s1508_s30 + $0x178] sm:$0xf]  ;;  %v265_v59 = vld [vmem:[%s1508_s30 + $0x1e0] sm:$0xff] }
  0x4f   : > { %v761_v18 = vadd.f32 %v760_v12, %v759_v13  ;;  %v466_v12 = vcombine.high %v253_v4, %v253_v4  ;;  %v554_v13 = vcombine.low %v464_v1, %v251_v62  ;;  %v788_v19 = vsel %vm710_vm1, %v553_v7, 0.0  ;;  %v266_v1 = vld [vmem:[%s1508_s30 + $0x1e8] sm:$0xff] }
  0x51   : > { %v763_v23 = vadd.f32 %v762_v16, %v761_v18  ;;  %v555_v18 = vcombine.low %v465_v6, %v252_v9  ;;  %v556_v22 = vcombine.low %v253_v4, %v466_v12  ;;  %v267_v6 = vld [vmem:[%s1508_s30 + $0x1f0] sm:$0xff] }
  0x53   : > { %v765_v28 = vadd.f32 %v764_v20, %v763_v23  ;;  %v790_v23 = vsel %vm710_vm1, %v554_v13, 0.0  ;;  %v792_v27 = vsel %vm710_vm1, %v555_v18, 0.0  ;;  %v477_v13 = vcombine.high %v267_v6, %v267_v6 }
  0x55   : > { %v767_v33 = vadd.f32 %v766_v26, %v765_v28  ;;  %v557_v26 = vcombine.low %v254_v10, %v467_v17  ;;  %v256_v28 = vld [vmem:[%s1508_s30 + $0x198] sm:$0xf]  ;;  %v270_v17 = vld [vmem:[%s1508_s30 + $0x208] sm:$0xff] }
  0x56   : > { %v559_v38 = vcombine.low %v256_v28, %v257_v24 }
  0x57   : > { %v769_v39 = vadd.f32 %v768_v31, %v767_v33  ;;  %v469_v31 = vcombine.high %v257_v24, %v257_v24  ;;  %v794_v33 = vsel %vm710_vm1, %v556_v22, 0.0  ;;  %v271_v22 = vld [vmem:[%s1508_s30 + $0x210] sm:$0xff]  ;;  %v479_v24 = vcombine.high %v270_v17, %v270_v17 }
  0x58   : > { %v800_v50 = vsel %vm710_vm1, %v559_v38, 0.0  ;;  %v480_v28 = vcombine.high %v271_v22, %v271_v22 }
  0x59   : > { %v771_v44 = vadd.f32 %v770_v36, %v769_v39  ;;  %v918_v36 = vld [vmem:[%s1782_s1] sm:$0xf]  ;;  %v796_v39 = vsel %vm710_vm1, %v557_v26, 0.0  ;;  %v560_v43 = vcombine.low %v469_v31, %v258_v29 }
  0x5a   : > { %1178 = vmatpush3.msk.msra.mxu0 %vm924_vm2, %v918_v36  ;;  %v273_v31 = vld [vmem:[%s1508_s30 + $0x220] sm:$0xff]  ;;  %v274_v36 = vld [vmem:[%s1508_s30 + $0x228] sm:$0xff] }
  0x5b   : > { %v773_v48 = vadd.f32 %v772_v42, %v771_v44  ;;  %v471_v42 = vcombine.high %v259_v34, %v259_v34  ;;  %v798_v44 = vsel %vm710_vm1, %v558_v32, 0.0  ;;  %v802_v0 = vsel %vm710_vm1, %v560_v43, 0.0 }
  0x5c   : > { %v481_v38 = vcombine.high %v273_v31, %v273_v31  ;;  %v482_v43 = vcombine.high %v274_v36, %v274_v36 }
  0x5d   : > { %v775_v53 = vadd.f32 %v774_v47, %v773_v48  ;;  %v472_v48 = vcombine.high %v261_v40, %v261_v40  ;;  %v562_v54 = vcombine.low %v471_v42, %v260_v45 }
  0x5f   : > { %v777_v58 = vadd.f32 %v776_v51, %v775_v53  ;;  %v263_v51 = vld [vmem:[%s1508_s30 + $0x1d0] sm:$0xff]  ;;  %v473_v53 = vcombine.high %v262_v46, %v262_v46  ;;  %v563_v57 = vcombine.low %v261_v40, %v472_v48  ;;  %v806_v62 = vsel %vm710_vm1, %v562_v54, 0.0 }
  0x60   : > { %v474_v56 = vcombine.high %v263_v51, %v263_v51 }
  0x61   : > { %v779_v63 = vadd.f32 %v778_v55, %v777_v58  ;;  %v804_v58 = vsel %vm710_vm1, %v561_v49, 0.0  ;;  %v574_v49 = vcombine.low %v481_v38, %v274_v36 }
  0x62   : > { %v565_v4 = vcombine.low %v263_v51, %v474_v56  ;;  %v276_v51 = vld [vmem:[%s1508_s30 + $0x238] sm:$0xf]  ;;  %v279_v56 = vld [vmem:[%s1508_s30 + $0x250] sm:$0xff] }
  0x63   : > { %v781_v5 = vadd.f32 %v780_v61, %v779_v63  ;;  %v564_v61 = vcombine.low %v262_v46, %v473_v53  ;;  %v264_v63 = vld [vmem:[%s1508_s30 + $0x1d8] sm:$0xf]  ;;  %v277_v46 = vld [vmem:[%s1508_s30 + $0x240] sm:$0xff] }
  0x64   : > { %v566_v9 = vcombine.low %v264_v63, %v265_v59  ;;  %v812_v15 = vsel %vm710_vm1, %v565_v4, 0.0  ;;  %v484_v54 = vcombine.high %v277_v46, %v277_v46 }
  0x65   : > { %v783_v11 = vadd.f32 %v782_v3, %v781_v5  ;;  %v475_v3 = vcombine.high %v265_v59, %v265_v59  ;;  %v808_v5 = vsel %vm710_vm1, %v563_v57, 0.0  ;;  %v810_v10 = vsel %vm710_vm1, %v564_v61, 0.0 }
  0x66   : > { %v814_v21 = vsel %vm710_vm1, %v566_v9, 0.0  ;;  %v577_v63 = vcombine.low %v277_v46, %v484_v54 }
  0x67   : > { %v785_v16 = vadd.f32 %v784_v8, %v783_v11  ;;  %v476_v8 = vcombine.high %v266_v1, %v266_v1  ;;  %v269_v11 = vld [vmem:[%s1508_s30 + $0x200] sm:$0xff] }
  0x69   : > { %v787_v20 = vadd.f32 %v786_v14, %v785_v16  ;;  %v567_v14 = vcombine.low %v475_v3, %v266_v1  ;;  %v268_v16 = vld [vmem:[%s1508_s30 + $0x1f8] sm:$0xf] }
  0x6b   : > { %v789_v25 = vadd.f32 %v788_v19, %v787_v20  ;;  %v478_v19 = vcombine.high %v269_v11, %v269_v11  ;;  %v568_v20 = vcombine.low %v476_v8, %v267_v6  ;;  %v816_v26 = vsel %vm710_vm1, %v567_v14, 0.0  ;;  %v280_v6 = vld [vmem:[%s1508_s30 + $0x258] sm:$0xf] }
  0x6d   : > { %v791_v30 = vadd.f32 %v790_v23, %v789_v25  ;;  %v569_v25 = vcombine.low %v477_v13, %v268_v16  ;;  %v570_v29 = vcombine.low %v269_v11, %v478_v19  ;;  %v836_v11 = vsel %vm710_vm1, %v577_v63, 0.0 }
  0x6f   : > { %v793_v35 = vadd.f32 %v792_v27, %v791_v30  ;;  %v818_v30 = vsel %vm710_vm1, %v568_v20, 0.0  ;;  %v820_v34 = vsel %vm710_vm1, %v569_v25, 0.0  ;;  %v822_v40 = vsel %vm710_vm1, %v570_v29, 0.0 }
  0x71   : > { %v795_v41 = vadd.f32 %v794_v33, %v793_v35  ;;  %v571_v33 = vcombine.low %v270_v17, %v479_v24  ;;  %v272_v35 = vld [vmem:[%s1508_s30 + $0x218] sm:$0xf]  ;;  %v285_v17 = vld [vmem:[%s1508_s30 + $0x280] sm:$0xff] }
  0x72   : > { %v490_v25 = vcombine.high %v285_v17, %v285_v17 }
  0x73   : > { %v797_v47 = vadd.f32 %v796_v39, %v795_v41  ;;  %v572_v39 = vcombine.low %v271_v22, %v480_v28  ;;  %v275_v41 = vld [vmem:[%s1508_s30 + $0x230] sm:$0xff]  ;;  %v824_v45 = vsel %vm710_vm1, %v571_v33, 0.0  ;;  %v284_v22 = vld [vmem:[%s1508_s30 + $0x278] sm:$0xf] }
  0x74   : > { %v483_v48 = vcombine.high %v275_v41, %v275_v41  ;;  %v287_v28 = vld [vmem:[%s1508_s30 + $0x290] sm:$0xff] }
  0x75   : > { %v799_v52 = vadd.f32 %v798_v44, %v797_v47  ;;  %v573_v44 = vcombine.low %v272_v35, %v273_v31  ;;  %v584_v35 = vcombine.low %v285_v17, %v490_v25 }
  0x76   : > { %v576_v59 = vcombine.low %v483_v48, %v276_v51 }
  0x77   : > { %v801_v55 = vadd.f32 %v800_v50, %v799_v52  ;;  %v826_v50 = vsel %vm710_vm1, %v572_v39, 0.0  ;;  %v278_v52 = vld [vmem:[%s1508_s30 + $0x248] sm:$0xff]  ;;  %v850_v46 = vsel %vm710_vm1, %v584_v35, 0.0 }
  0x79   : > { %v803_v60 = vadd.f32 %v802_v0, %v801_v55  ;;  %v575_v0 = vcombine.low %v482_v43, %v275_v41  ;;  %v828_v55 = vsel %vm710_vm1, %v573_v44, 0.0  ;;  %v288_v41 = vld [vmem:[%s1508_s30 + $0x298] sm:$0xf] }
  0x7b   : > { %v805_v2 = vadd.f32 %v804_v58, %v803_v60  ;;  %v485_v58 = vcombine.high %v278_v52, %v278_v52  ;;  %v830_v60 = vsel %vm710_vm1, %v574_v49, 0.0  ;;  %v832_v1 = vsel %vm710_vm1, %v575_v0, 0.0 }
  0x7d   : > { %v807_v7 = vadd.f32 %v806_v62, %v805_v2  ;;  %v486_v62 = vcombine.high %v279_v56, %v279_v56  ;;  %v281_v2 = vld [vmem:[%s1508_s30 + $0x260] sm:$0xff]  ;;  %v578_v4 = vcombine.low %v278_v52, %v485_v58 }
  0x7e   : > { %v487_v9 = vcombine.high %v281_v2, %v281_v2  ;;  %v293_v52 = vld [vmem:[%s1508_s30 + $0x2c0] sm:$0xff] }
  0x7f   : > { %v809_v12 = vadd.f32 %v808_v5, %v807_v7  ;;  %v834_v5 = vsel %vm710_vm1, %v576_v59, 0.0  ;;  %v282_v7 = vld [vmem:[%s1508_s30 + $0x268] sm:$0xff]  ;;  %v838_v16 = vsel %vm710_vm1, %v578_v4, 0.0  ;;  %v496_v59 = vcombine.high %v293_v52, %v293_v52 }
  0x80   : > { %v488_v14 = vcombine.high %v282_v7, %v282_v7  ;;  %v581_v20 = vcombine.low %v487_v9, %v282_v7 }
  0x81   : > { %v811_v18 = vadd.f32 %v810_v10, %v809_v12  ;;  %v579_v10 = vcombine.low %v279_v56, %v486_v62  ;;  %v283_v12 = vld [vmem:[%s1508_s30 + $0x270] sm:$0xff]  ;;  %v292_v56 = vld [vmem:[%s1508_s30 + $0x2b8] sm:$0xf] }
  0x82   : > { %v489_v19 = vcombine.high %v283_v12, %v283_v12  ;;  %v295_v62 = vld [vmem:[%s1508_s30 + $0x2d0] sm:$0xff] }
  0x83   : > { %v813_v23 = vadd.f32 %v812_v15, %v811_v18  ;;  %v580_v15 = vcombine.low %v280_v6, %v281_v2  ;;  %v591_v6 = vcombine.low %v293_v52, %v496_v59 }
  0x84   : > { %v583_v31 = vcombine.low %v489_v19, %v284_v22 }
  0x85   : > { %v815_v27 = vadd.f32 %v814_v21, %v813_v23  ;;  %v840_v21 = vsel %vm710_vm1, %v579_v10, 0.0  ;;  %v286_v23 = vld [vmem:[%s1508_s30 + $0x288] sm:$0xff]  ;;  %v864_v17 = vsel %vm710_vm1, %v591_v6, 0.0 }
  0x87   : > { %v817_v32 = vadd.f32 %v816_v26, %v815_v27  ;;  %v582_v26 = vcombine.low %v488_v14, %v283_v12  ;;  %v842_v27 = vsel %vm710_vm1, %v580_v15, 0.0  ;;  %v296_v12 = vld [vmem:[%s1508_s30 + $0x2d8] sm:$0xf] }
  0x89   : > { %v819_v37 = vadd.f32 %v818_v30, %v817_v32  ;;  %v491_v30 = vcombine.high %v286_v23, %v286_v23  ;;  %v844_v32 = vsel %vm710_vm1, %v581_v20, 0.0  ;;  %v846_v36 = vsel %vm710_vm1, %v582_v26, 0.0 }
  0x8b   : > { %v821_v42 = vadd.f32 %v820_v34, %v819_v37  ;;  %v492_v34 = vcombine.high %v287_v28, %v287_v28  ;;  %v289_v37 = vld [vmem:[%s1508_s30 + $0x2a0] sm:$0xff]  ;;  %v585_v39 = vcombine.low %v286_v23, %v491_v30 }
  0x8c   : > { %v493_v44 = vcombine.high %v289_v37, %v289_v37  ;;  %v301_v23 = vld [vmem:[%s1508_s30 + $0x300] sm:$0xff] }
  0x8d   : > { %v823_v47 = vadd.f32 %v822_v40, %v821_v42  ;;  %v848_v40 = vsel %vm710_vm1, %v583_v31, 0.0  ;;  %v290_v42 = vld [vmem:[%s1508_s30 + $0x2a8] sm:$0xff]  ;;  %v852_v51 = vsel %vm710_vm1, %v585_v39, 0.0  ;;  %v502_v31 = vcombine.high %v301_v23, %v301_v23 }
  0x8e   : > { %v494_v49 = vcombine.high %v290_v42, %v290_v42  ;;  %v588_v0 = vcombine.low %v493_v44, %v290_v42 }
  0x8f   : > { %v825_v53 = vadd.f32 %v824_v45, %v823_v47  ;;  %v586_v45 = vcombine.low %v287_v28, %v492_v34  ;;  %v291_v47 = vld [vmem:[%s1508_s30 + $0x2b0] sm:$0xff]  ;;  %v300_v28 = vld [vmem:[%s1508_s30 + $0x2f8] sm:$0xf] }
  0x90   : > { %v495_v54 = vcombine.high %v291_v47, %v291_v47  ;;  %v303_v34 = vld [vmem:[%s1508_s30 + $0x310] sm:$0xff] }
  0x91   : > { %v827_v57 = vadd.f32 %v826_v50, %v825_v53  ;;  %v587_v50 = vcombine.low %v288_v41, %v289_v37  ;;  %v598_v41 = vcombine.low %v301_v23, %v502_v31 }
  0x92   : > { %v590_v2 = vcombine.low %v495_v54, %v292_v56 }
  0x93   : > { %v829_v61 = vadd.f32 %v828_v55, %v827_v57  ;;  %v854_v55 = vsel %vm710_vm1, %v586_v45, 0.0  ;;  %v294_v57 = vld [vmem:[%s1508_s30 + $0x2c8] sm:$0xff]  ;;  %v878_v52 = vsel %vm710_vm1, %v598_v41, 0.0 }
  0x95   : > { %v831_v3 = vadd.f32 %v830_v60, %v829_v61  ;;  %v589_v60 = vcombine.low %v494_v49, %v291_v47  ;;  %v856_v61 = vsel %vm710_vm1, %v587_v50, 0.0  ;;  %v304_v47 = vld [vmem:[%s1508_s30 + $0x318] sm:$0xf] }
  0x97   : > { %v833_v8 = vadd.f32 %v832_v1, %v831_v3  ;;  %v497_v1 = vcombine.high %v294_v57, %v294_v57  ;;  %v858_v3 = vsel %vm710_vm1, %v588_v0, 0.0  ;;  %v860_v7 = vsel %vm710_vm1, %v589_v60, 0.0 }
  0x99   : > { %v835_v13 = vadd.f32 %v834_v5, %v833_v8  ;;  %v498_v5 = vcombine.high %v295_v62, %v295_v62  ;;  %v297_v8 = vld [vmem:[%s1508_s30 + $0x2e0] sm:$0xff]  ;;  %v592_v10 = vcombine.low %v294_v57, %v497_v1 }
  0x9a   : > { %v499_v15 = vcombine.high %v297_v8, %v297_v8  ;;  %v309_v57 = vld [vmem:[%s1508_s30 + $0x340] sm:$0xff] }
  0x9b   : > { %v837_v18 = vadd.f32 %v836_v11, %v835_v13  ;;  %v862_v11 = vsel %vm710_vm1, %v590_v2, 0.0  ;;  %v298_v13 = vld [vmem:[%s1508_s30 + $0x2e8] sm:$0xff]  ;;  %v866_v22 = vsel %vm710_vm1, %v592_v10, 0.0  ;;  %v508_v2 = vcombine.high %v309_v57, %v309_v57 }
  0x9c   : > { %v500_v20 = vcombine.high %v298_v13, %v298_v13  ;;  %v595_v26 = vcombine.low %v499_v15, %v298_v13 }
  0x9d   : > { %v839_v24 = vadd.f32 %v838_v16, %v837_v18  ;;  %v593_v16 = vcombine.low %v295_v62, %v498_v5  ;;  %v299_v18 = vld [vmem:[%s1508_s30 + $0x2f0] sm:$0xff]  ;;  %v308_v62 = vld [vmem:[%s1508_s30 + $0x338] sm:$0xf] }
  0x9e   : > { %v501_v25 = vcombine.high %v299_v18, %v299_v18  ;;  %v311_v5 = vld [vmem:[%s1508_s30 + $0x350] sm:$0xff] }
  0x9f   : > { %v841_v29 = vadd.f32 %v840_v21, %v839_v24  ;;  %v594_v21 = vcombine.low %v296_v12, %v297_v8  ;;  %v605_v12 = vcombine.low %v309_v57, %v508_v2 }
  0xa0   : > { %v597_v37 = vcombine.low %v501_v25, %v300_v28 }
  0xa1   : > { %v843_v33 = vadd.f32 %v842_v27, %v841_v29  ;;  %v868_v27 = vsel %vm710_vm1, %v593_v16, 0.0  ;;  %v302_v29 = vld [vmem:[%s1508_s30 + $0x308] sm:$0xff]  ;;  %v892_v23 = vsel %vm710_vm1, %v605_v12, 0.0 }
  0xa3   : > { %v845_v38 = vadd.f32 %v844_v32, %v843_v33  ;;  %v596_v32 = vcombine.low %v500_v20, %v299_v18  ;;  %v870_v33 = vsel %vm710_vm1, %v594_v21, 0.0  ;;  %v312_v18 = vld [vmem:[%s1508_s30 + $0x358] sm:$0xf] }
  0xa5   : > { %v847_v43 = vadd.f32 %v846_v36, %v845_v38  ;;  %v503_v36 = vcombine.high %v302_v29, %v302_v29  ;;  %v872_v38 = vsel %vm710_vm1, %v595_v26, 0.0  ;;  %v874_v42 = vsel %vm710_vm1, %v596_v32, 0.0 }
  0xa7   : > { %v849_v48 = vadd.f32 %v848_v40, %v847_v43  ;;  %v504_v40 = vcombine.high %v303_v34, %v303_v34  ;;  %v305_v43 = vld [vmem:[%s1508_s30 + $0x320] sm:$0xff]  ;;  %v599_v45 = vcombine.low %v302_v29, %v503_v36 }
  0xa8   : > { %v505_v50 = vcombine.high %v305_v43, %v305_v43 }
  0xa9   : > { %v851_v53 = vadd.f32 %v850_v46, %v849_v48  ;;  %v876_v46 = vsel %vm710_vm1, %v597_v37, 0.0  ;;  %v306_v48 = vld [vmem:[%s1508_s30 + $0x328] sm:$0xff]  ;;  %v880_v56 = vsel %vm710_vm1, %v599_v45, 0.0 }
  0xaa   : > { %v506_v0 = vcombine.high %v306_v48, %v306_v48  ;;  %v602_v60 = vcombine.low %v505_v50, %v306_v48 }
  0xab   : > { %v853_v58 = vadd.f32 %v852_v51, %v851_v53  ;;  %v600_v51 = vcombine.low %v303_v34, %v504_v40  ;;  %v307_v53 = vld [vmem:[%s1508_s30 + $0x330] sm:$0xff] }
  0xac   : > { %v507_v59 = vcombine.high %v307_v53, %v307_v53 }
  0xad   : > { %v855_v63 = vadd.f32 %v854_v55, %v853_v58  ;;  %v601_v55 = vcombine.low %v304_v47, %v305_v43 }
  0xae   : > { %v604_v8 = vcombine.low %v507_v59, %v308_v62 }
  0xaf   : > { %v857_v4 = vadd.f32 %v856_v61, %v855_v63  ;;  %v882_v61 = vsel %vm710_vm1, %v600_v51, 0.0  ;;  %v310_v63 = vld [vmem:[%s1508_s30 + $0x348] sm:$0xff]  ;;  %v317_v51 = vld [vmem:[#allocation2] sm:$0x1] }
  0xb1   : > { %v859_v9 = vadd.f32 %v858_v3, %v857_v4  ;;  %v603_v3 = vcombine.low %v506_v0, %v307_v53  ;;  %v884_v4 = vsel %vm710_vm1, %v601_v55, 0.0  ;;  %v999_v55 = vld [vmem:[%s1783_s2] sm:$0xff] }
  0xb2   : > { %1183 = vmatpush3.msra.mxu1 %v999_v55 }
  0xb3   : > { %v861_v14 = vadd.f32 %v860_v7, %v859_v9  ;;  %v509_v7 = vcombine.high %v310_v63, %v310_v63  ;;  %v886_v9 = vsel %vm710_vm1, %v602_v60, 0.0  ;;  %v888_v13 = vsel %vm710_vm1, %v603_v3, 0.0 }
  0xb5   : > { %v863_v19 = vadd.f32 %v862_v11, %v861_v14  ;;  %v510_v11 = vcombine.high %v311_v5, %v311_v5  ;;  %v313_v14 = vld [vmem:[%s1508_s30 + $0x360] sm:$0xff]  ;;  %v606_v16 = vcombine.low %v310_v63, %v509_v7 }
  0xb6   : > { %v511_v21 = vcombine.high %v313_v14, %v313_v14 }
  0xb7   : > { %v865_v24 = vadd.f32 %v864_v17, %v863_v19  ;;  %v890_v17 = vsel %vm710_vm1, %v604_v8, 0.0  ;;  %v314_v19 = vld [vmem:[%s1508_s30 + $0x368] sm:$0xff]  ;;  %v894_v28 = vsel %vm710_vm1, %v606_v16, 0.0 }
  0xb8   : > { %v512_v26 = vcombine.high %v314_v19, %v314_v19  ;;  %v609_v31 = vcombine.low %v511_v21, %v314_v19 }
  0xb9   : > { %v867_v30 = vadd.f32 %v866_v22, %v865_v24  ;;  %v607_v22 = vcombine.low %v311_v5, %v510_v11  ;;  %v315_v24 = vld [vmem:[%s1508_s30 + $0x370] sm:$0xff] }
  0xbb   : > { %v869_v35 = vadd.f32 %v868_v27, %v867_v30  ;;  %v608_v27 = vcombine.low %v312_v18, %v313_v14  ;;  %v513_v30 = vcombine.high %v315_v24, %v315_v24  ;;  %v896_v32 = vsel %vm710_vm1, %v607_v22, 0.0 }
  0xbd   : > { %v871_v39 = vadd.f32 %v870_v33, %v869_v35  ;;  %v316_v33 = vld [vmem:[%s1508_s30 + $0x378] sm:$0xf]  ;;  %v610_v35 = vcombine.low %v512_v26, %v315_v24  ;;  %v898_v36 = vsel %vm710_vm1, %v608_v27, 0.0 }
  0xbf   : > { %v873_v44 = vadd.f32 %v872_v38, %v871_v39  ;;  %v611_v38 = vcombine.low %v513_v30, %v316_v33  ;;  %v900_v39 = vsel %vm710_vm1, %v609_v31, 0.0  ;;  %v902_v41 = vsel %vm710_vm1, %v610_v35, 0.0 }
  0xc1   : > { %v875_v49 = vadd.f32 %v874_v42, %v873_v44  ;;  %v904_v43 = vsel %vm710_vm1, %v611_v38, 0.0 }
  0xc3   : > { %v877_v54 = vadd.f32 %v876_v46, %v875_v49 }
  0xc5   : > { %v879_v58 = vadd.f32 %v878_v52, %v877_v54 }
  0xc7   : > { %v881_v1 = vadd.f32 %v880_v56, %v879_v58 }
  0xc9   : > { %v883_v6 = vadd.f32 %v882_v61, %v881_v1 }
  0xcb   : > { %v885_v10 = vadd.f32 %v884_v4, %v883_v6 }
  0xcd   : > { %v887_v15 = vadd.f32 %v886_v9, %v885_v10 }
  0xcf   : > { %v889_v20 = vadd.f32 %v888_v13, %v887_v15 }
  0xd1   : > { %v891_v25 = vadd.f32 %v890_v17, %v889_v20 }
  0xd3   : > { %v893_v29 = vadd.f32 %v892_v23, %v891_v25 }
  0xd5   : > { %v895_v34 = vadd.f32 %v894_v28, %v893_v29 }
  0xd7   : > { %v897_v37 = vadd.f32 %v896_v32, %v895_v34 }
  0xd9   : > { %v899_v40 = vadd.f32 %v898_v36, %v897_v37 }
  0xdb   : > { %v901_v42 = vadd.f32 %v900_v39, %v899_v40 }
  0xdd   : > { %v903_v44 = vadd.f32 %v902_v41, %v901_v42 }
  0xdf   : > { %v905_v45 = vadd.f32 %v904_v43, %v903_v44 }
  0xe1   : > { %v906_v46 = vrot.slane %v905_v45, 4 }
  0xe3   : > { %v907_v47 = vadd.f32 %v906_v46, %v905_v45 }
  0xe5   : > { %v908_v48 = vrot.slane %v907_v47, 2 }
  0xe7   : > { %v909_v49 = vadd.f32 %v908_v48, %v907_v47 }
  0xe9   : > { %v910_v50 = vrot.slane %v909_v49, 1 }
  0xeb   : > { %v911_v52 = vadd.f32 %v910_v50, %v909_v49 }
  0xed   : > { %v912_v53 = vadd.f32 %v911_v52, %v317_v51 }
  0xef   : > { %914 = vst.msk [vmem:[#allocation2] sm:$0x1] %vm203_vm0, %v912_v53 }
  0xf6   : > { %v919_v54 = vld [vmem:[#allocation2] sm:$0x1] }
  0xf7   : > { %v920_v0 = vmul.f32 0.00390625, %v919_v54 }
  0xf9   : > { %1180 = vmatmul.mubr.msk.f32.vlgmr.msra.gmra.mxu0 %vm710_vm1, %v920_v0 }
 0x1b9   : > { %v994_v56 = vpop.f32.mrf.mxu0 }
 0x1ba   : > { %v998_v57 = vmax.f32 %v994_v56, 0.0 }
 0x1bb   : > { %v1181_v58 = vpop.f32.mrf.mxu0 }
 0x1bc   : > { %1185 = vmatmul.mubr.msk.f32.vlgmr.msra.gmra.mxu1 %vm1000_vm4, %v998_v57 }
 0x27c   : > { %v1070_v59 = vpop.f32.mrf.mxu1 }
 0x27d   : > { %1075 = vst.msk [vmem:[%s187_s10] sm:$0x1] %vm1074_vm5, %v1070_v59 }
 0x27e   : > { %v1186_v60 = vpop.f32.mrf.mxu1 }
 0x27f   : > { %1356 = shalt.err (!%p1353_p5)
}
 0x280   : > { %s1357_s29 = scalar_lea.hbm %s1735_s21, 16  ;;  %s1361_s5 = scalar_lea.hbm %s1784_s3, 32 }
 0x281   : > { %p1358_p6 = scmp.ne.s32.totalorder %s1735_s21, %s1357_s29  ;;  %p1362_p10 = scmp.lt.s32.totalorder %s1735_s21, %s1784_s3 }
 0x282   : > { %p1363_p11 = scmp.lt.s32.totalorder %s1361_s5, %s1357_s29 }
 0x283   : > { %p1359_p7 = pnand %p1358_p6, %p1484_p4 }
 0x284   : > { %p1364_p12 = por %p1363_p11, %p1362_p10 }
 0x285   : > { %p1360_p9 = pneg %p1359_p7 }
 0x287   : > { %p1365_p13 = pnand %p1364_p12, %p1360_p9 }
 0x289   : > { %1368 = shalt.err (!%p1365_p13)
}
 0x28a   : > { %1188 = dma.vmem_to_hbm [thread:$0]  (%p1484_p4), %s1737_s11, 16, %s1735_s21, %s1077_s23  }
 0x28b PF: > { %p1194_p0 = scmp.ge.s32.totalorder %s1419_s17, 2  ;;  %s1101_s8 = sand.u32 1, %s1399_s12  }
 0x28c   : > { %s1102_s9 = scalar_lea.sflag [#allocation4], %s1101_s8 }
 0x28d   : > { %p1191_p1 = pnand %p1194_p0, %p1491_p8 }
 0x28f   : > { %p1192_p2 = pneg %p1191_p1 }
 0x291   : > { %1394 = dma.done.wait (%p1192_p2), %s1102_s9, 16  }
 0x292   : > { %1396 = vsyncadd (%p1192_p2), %s1102_s9, 4294967280  ;;  %s16_s17 = sadd.s32 1, %s1419_s17   ;;  %s1787_s12 = smov %s1403_s13 }
 0x293   : > { %p13_p3 = scmp.ge.s32.totalorder %s16_s17, 4   ;;  %s1788_s13 = smov %s1407_s14 }
 0x294   : > { %s1789_s14 = smov %s1497_s25  ;;  %s1790_s15 = smov %s1415_s16 }
 0x295   : > { %s1791_s16 = smov %s1793_s20  ;;  %15 = sbr.rel (!%p13_p3) target bundleno = 4 (0x4), region = 75 }
 0x29a   :  { %1106 = vsyncpa [#allocation4], 1 }
 0x29b   :  { %1108 = vsyncpa [#allocation4 + $0x1], 1 }

</bundles_post_ra>
